<compile_context>
chip_gen: v6e
topology: v6e:2x2x1
jax: 0.10.0
libtpu: 0.0.40
codegen_flags: <defaults>
</compile_context>

<pallas_src>
import functools

import jax
import jax.numpy as jnp
from jax.experimental import pallas as pl
from jax.experimental.pallas import tpu as pltpu


# ----------------------------------------------------------------------------
# Pallas kernel: fused NadWat iso-spline interpolation + residual add
# ----------------------------------------------------------------------------
def _nadwat_fused_kernel(xa_ref, ya_ref, vw_ref, o_ref, acc_ref, m_ref, *,
                         cdim, num_m_tiles):
    # xa: (D+2, Nt)  rows = [x_0..x_{D-1}, 1, -c*|x|^2]   (queries, lane-dense)
    # ya: (Mt, D+2)  cols = [2c*y_0..2c*y_{D-1}, -c*|y|^2, 1]
    # vw: (C+1, Mt)  rows = [(v*w)_0..(v*w)_{C-1}, w]
    # o : (C, Nt)    flowed points (query + displacement), lane-dense
    # acc: (C+1, Nt) running [numerator; denominator]; m: (1, Nt) running max.
    xa = xa_ref[0].astype(jnp.float32)
    ya = ya_ref[0].astype(jnp.float32)
    vw = vw_ref[0].astype(jnp.float32)

    # exponent s[m, n] = -c*(|x_n|^2 + |y_m|^2 - 2 x_n.y_m) via one MXU matmul
    s = jax.lax.dot_general(ya, xa, (((1,), (0,)), ((), ())),
                            preferred_element_type=jnp.float32)          # (Mt, Nt)

    if num_m_tiles == 1:
        # Single control tile: no cross-tile state, no accumulator round-trip.
        m_new = jnp.max(s, axis=0, keepdims=True)                        # (1, Nt)
        p = jnp.exp(s - m_new)                                           # (Mt, Nt)
        acc = jax.lax.dot_general(vw, p, (((1,), (0,)), ((), ())),
                                  preferred_element_type=jnp.float32)    # (C+1, Nt)
        num = acc[:cdim, :]
        den = acc[cdim:cdim + 1, :]
        o_ref[0] = (xa[:cdim, :] + num * pl.reciprocal(den)).astype(o_ref.dtype)
        return

    m_idx = pl.program_id(2)

    @pl.when(m_idx == 0)
    def _init():
        acc_ref[...] = jnp.zeros_like(acc_ref)
        m_ref[...] = jnp.full_like(m_ref, -jnp.inf)

    # online (flash-attention style) max shift across M tiles -- exact
    m_old = m_ref[...]                                                   # (1, Nt)
    m_new = jnp.maximum(m_old, jnp.max(s, axis=0, keepdims=True))        # (1, Nt)
    alpha = jnp.exp(m_old - m_new)                                       # (1, Nt)
    p = jnp.exp(s - m_new)                                               # (Mt, Nt)

    # fused numerator / denominator: one matmul over the (Mt, Nt) kernel tile
    contrib = jax.lax.dot_general(vw, p, (((1,), (0,)), ((), ())),
                                  preferred_element_type=jnp.float32)    # (C+1, Nt)
    acc_ref[...] = acc_ref[...] * alpha + contrib
    m_ref[...] = m_new

    @pl.when(m_idx == num_m_tiles - 1)
    def _finalize():
        num = acc_ref[:cdim, :]                                          # (C, Nt)
        den = acc_ref[cdim:cdim + 1, :]                                  # (1, Nt)
        disp = num * pl.reciprocal(den)                                  # exact recip
        o_ref[0] = (xa[:cdim, :] + disp).astype(o_ref.dtype)             # residual add


def _round_up(a, b):
    return (a + b - 1) // b * b


def nadwat_spline_flow(queries, control_points, control_value, control_weights,
                       kernel_scale, n_tile=512, m_tile=1024):
    """Returns queries + NadWatIsoSpline(queries, control, value, weights)."""
    B, Nq, D = queries.shape
    _, M, C = control_value.shape
    assert C == D, "spline displacement field must have same dim as points"
    c = 0.5 / (kernel_scale * kernel_scale)
    lane = 128

    n_t = min(n_tile, _round_up(Nq, lane))
    m_t = min(m_tile, _round_up(M, lane))
    n_pad = _round_up(Nq, n_t)
    m_pad = _round_up(M, m_t)

    # ---- wrapper-side precompute (shared by every tile / both merged calls) ----
    # augmented queries: (B, D+2, Npad), lane-dense in N
    x2 = jnp.sum(queries * queries, axis=-1, keepdims=True)
    x_aug = jnp.concatenate([queries, jnp.ones_like(x2), -c * x2], axis=-1)
    x_aug = jnp.pad(x_aug, ((0, 0), (0, n_pad - Nq), (0, 0)))
    x_aug_t = jnp.transpose(x_aug, (0, 2, 1))                            # (B, D+2, Npad)

    # augmented controls: (B, Mpad, D+2); padded rows get a huge negative |y|^2
    # term so they can never win the per-query max (their weight is 0 anyway).
    y2 = jnp.sum(control_points * control_points, axis=-1, keepdims=True)
    y_aug = jnp.concatenate([2.0 * c * control_points, -c * y2,
                             jnp.ones_like(y2)], axis=-1)                # (B, M, D+2)
    y_aug = jnp.pad(y_aug, ((0, 0), (0, m_pad - M), (0, 0)))
    if m_pad > M:
        y_aug = y_aug.at[:, M:, D].set(-1e30)

    # fused value/weight operand: (B, C+1, Mpad)
    vw = jnp.concatenate([control_value * control_weights, control_weights], axis=-1)
    vw = jnp.pad(vw, ((0, 0), (0, m_pad - M), (0, 0)))
    vw_t = jnp.transpose(vw, (0, 2, 1))                                  # (B, C+1, Mpad)

    d_aug = D + 2
    c_p1 = C + 1
    n_tiles = n_pad // n_t
    m_tiles = m_pad // m_t
    grid = (B, n_tiles, m_tiles)

    out = pl.pallas_call(
        functools.partial(_nadwat_fused_kernel, cdim=C, num_m_tiles=m_tiles),
        out_shape=jax.ShapeDtypeStruct((B, C, n_pad), queries.dtype),
        grid_spec=pltpu.PrefetchScalarGridSpec(
            num_scalar_prefetch=0,
            grid=grid,
            in_specs=[
                pl.BlockSpec((1, d_aug, n_t), lambda b, n, m: (b, 0, n)),
                pl.BlockSpec((1, m_t, d_aug), lambda b, n, m: (b, m, 0)),
                pl.BlockSpec((1, c_p1, m_t), lambda b, n, m: (b, 0, m)),
            ],
            out_specs=pl.BlockSpec((1, C, n_t), lambda b, n, m: (b, 0, n)),
            scratch_shapes=[
                pltpu.VMEM((c_p1, n_t), jnp.float32),   # num/den accumulator
                pltpu.VMEM((1, n_t), jnp.float32),      # running row max
            ],
        ),
        compiler_params=pltpu.CompilerParams(
            dimension_semantics=("parallel", "parallel", "arbitrary")),
    )(x_aug_t, y_aug, vw_t)

    return jnp.transpose(out[:, :, :Nq], (0, 2, 1))                      # (B, Nq, C)


# ----------------------------------------------------------------------------
# Pallas kernel: spline_reg -> (reg_param ** 2).sum(2).mean(1)
# ----------------------------------------------------------------------------
def _spline_reg_kernel(p_ref, o_ref):
    p = p_ref[...].astype(jnp.float32)                     # (B, M, D)
    sq = jnp.sum(p * p, axis=2)                            # (B, M)
    o_ref[...] = jnp.mean(sq, axis=1, keepdims=True).astype(o_ref.dtype)  # (B, 1)


def spline_reg(reg_param):
    B = reg_param.shape[0]
    out = pl.pallas_call(
        _spline_reg_kernel,
        out_shape=jax.ShapeDtypeStruct((B, 1), reg_param.dtype),
    )(reg_param)
    return out[:, 0]


# ----------------------------------------------------------------------------
# FlowModel forward (model_type='spline', use_aniso_postgradientflow=False)
# ----------------------------------------------------------------------------
class FlowModelPallas:
    def __init__(self, spline_kernel_scale=0.05, dense_mode=False,
                 n_tile=512, m_tile=1024):
        self.kernel_scale = spline_kernel_scale
        self.dense_mode = dense_mode
        self.n_tile = n_tile
        self.m_tile = m_tile

    def __call__(self, toflow_points, control_points, reg_param, control_weights):
        B, N, D = toflow_points.shape
        M = control_points.shape[1]
        # merge the control->control and toflow->control interpolations into one call
        if self.dense_mode:
            queries = control_points
        else:
            queries = jnp.concatenate([control_points, toflow_points], axis=1)

        flowed_all = nadwat_spline_flow(queries, control_points, reg_param,
                                        control_weights, self.kernel_scale,
                                        n_tile=self.n_tile, m_tile=self.m_tile)
        flowed_control_points = flowed_all[:, :M]
        if self.dense_mode:
            flowed_points = flowed_control_points
        else:
            flowed_points = flowed_all[:, M:M + N]

        reg_loss = spline_reg(reg_param)
        return flowed_points, flowed_control_points, reg_loss


# ----------------------------------------------------------------------------
# Pure-JAX reference for validation
# ----------------------------------------------------------------------------
def _nadwat_ref(x, y, v, w, scale):
    d2 = jnp.sum((x[:, :, None, :] - y[:, None, :, :]) ** 2, axis=-1) / (scale * scale)
    k = jnp.exp(-0.5 * d2)                                  # (B, N, M)
    kw = k * w[:, None, :, 0]                               # (B, N, M)
    num = jnp.einsum("bnm,bmc->bnc", kw, v)
    den = jnp.sum(kw, axis=-1, keepdims=True)
    return num / den


def _forward_ref(toflow_points, control_points, reg_param, control_weights,
                 scale, dense_mode):
    control_disp = _nadwat_ref(control_points, control_points, reg_param,
                               control_weights, scale)
    flowed_control_points = control_points + control_disp
    if dense_mode:
        flowed_points = flowed_control_points
    else:
        sm_disp = _nadwat_ref(toflow_points, control_points, reg_param,
                              control_weights, scale)
        flowed_points = toflow_points + sm_disp
    reg_loss = jnp.mean(jnp.sum(reg_param ** 2, axis=2), axis=1)
    return flowed_points, flowed_control_points, reg_loss


def _run_case(key, B, N, M, D, scale, box, n_tile, m_tile):
    k1, k2, k3 = jax.random.split(key, 3)
    toflow_points = jax.random.uniform(k1, (B, N, D), jnp.float32) * box
    control_points = jax.random.uniform(k2, (B, M, D), jnp.float32) * box
    reg_param = jax.random.normal(k3, (B, M, D), jnp.float32) * 0.01
    control_weights = jnp.full((B, M, 1), 1.0 / M, jnp.float32)

    model = FlowModelPallas(spline_kernel_scale=scale, dense_mode=False,
                            n_tile=n_tile, m_tile=m_tile)
    flowed, flowed_ctrl, reg = model(toflow_points, control_points, reg_param,
                                     control_weights)
    jax.block_until_ready((flowed, flowed_ctrl, reg))

    flowed_r, flowed_ctrl_r, reg_r = _forward_ref(
        toflow_points, control_points, reg_param, control_weights, scale, False)

    assert jnp.allclose(flowed, flowed_r, rtol=1e-4, atol=1e-5), "flowed mismatch"
    assert jnp.allclose(flowed_ctrl, flowed_ctrl_r, rtol=1e-4, atol=1e-5), \
        "flowed_control mismatch"
    assert jnp.allclose(reg, reg_r, rtol=1e-4, atol=1e-6), "reg mismatch"


if __name__ == "__main__":
    key = jax.random.PRNGKey(0)
    k_small, k_big = jax.random.split(key)

    # small case: single M tile -> exercises the specialized no-running-max path
    _run_case(k_small, B=2, N=16, M=8, D=3, scale=0.05, box=0.1,
              n_tile=512, m_tile=1024)

    # larger case exercising the (B, N-tile, M-tile) grid, the online max shift
    # across M tiles, and non-divisible padding
    _run_case(k_big, B=2, N=200, M=300, D=3, scale=0.05, box=0.2,
              n_tile=128, m_tile=128)

    print("KERNEL_OK")
</pallas_src>

<mosaic_0001>
module attributes {stable_mosaic.version = 11 : i64} {
  func.func @_nadwat_fused_kernel(%arg0: i32, %arg1: i32, %arg2: i32, %arg3: memref<1x5x128xf32, #tpu.memory_space<vmem>>, %arg4: memref<1x128x5xf32, #tpu.memory_space<vmem>>, %arg5: memref<1x4x128xf32, #tpu.memory_space<vmem>>, %arg6: memref<1x3x128xf32, #tpu.memory_space<vmem>>, %arg7: memref<4x128xf32, #tpu.memory_space<vmem>>, %arg8: memref<1x128xf32, #tpu.memory_space<vmem>>) attributes {dimension_semantics = [#tpu.dimension_semantics<parallel>, #tpu.dimension_semantics<parallel>, #tpu.dimension_semantics<arbitrary>], iteration_bounds = array<i64: 2, 1, 1>, scalar_prefetch = 0 : i64, scratch_operands = 2 : i64, tpu.core_type = #tpu.core_type<tc>, window_params = [{transform_indices = @transform_0, window_bounds = array<i64: 1, 5, 128>}, {transform_indices = @transform_1, window_bounds = array<i64: 1, 128, 5>}, {transform_indices = @transform_2, window_bounds = array<i64: 1, 4, 128>}, {transform_indices = @transform_3, window_bounds = array<i64: 1, 3, 128>}]} {
    %c0 = arith.constant 0 : index
    %c0_0 = arith.constant 0 : index
    %c0_1 = arith.constant 0 : index
    %0 = vector.load %arg3[%c0, %c0_0, %c0_1] : memref<1x5x128xf32, #tpu.memory_space<vmem>>, vector<1x5x128xf32>
    %1 = vector.shape_cast %0 : vector<1x5x128xf32> to vector<5x128xf32>
    %c0_2 = arith.constant 0 : index
    %c0_3 = arith.constant 0 : index
    %c0_4 = arith.constant 0 : index
    %2 = vector.load %arg4[%c0_2, %c0_3, %c0_4] : memref<1x128x5xf32, #tpu.memory_space<vmem>>, vector<1x128x5xf32>
    %3 = vector.shape_cast %2 : vector<1x128x5xf32> to vector<128x5xf32>
    %c0_5 = arith.constant 0 : index
    %c0_6 = arith.constant 0 : index
    %c0_7 = arith.constant 0 : index
    %4 = vector.load %arg5[%c0_5, %c0_6, %c0_7] : memref<1x4x128xf32, #tpu.memory_space<vmem>>, vector<1x4x128xf32>
    %5 = vector.shape_cast %4 : vector<1x4x128xf32> to vector<4x128xf32>
    %cst = arith.constant dense<0.000000e+00> : vector<128x128xf32>
    %6 = tpu.matmul %3, %1, %cst {dimension_numbers = #tpu.dot_dimension_numbers<[1], [0], [0], [1], [0, 0, 1, 1], [], []>} : vector<128x5xf32>, vector<5x128xf32>, vector<128x128xf32> -> vector<128x128xf32>
    %cst_8 = arith.constant dense<0xFF800000> : vector<128xf32>
    %7 = vector.multi_reduction <maximumf>, %6, %cst_8 [0] : vector<128x128xf32> to vector<128xf32>
    %8 = vector.shape_cast %7 : vector<128xf32> to vector<1x128xf32>
    %9 = vector.broadcast %8 : vector<1x128xf32> to vector<128x128xf32>
    %10 = arith.subf %6, %9 : vector<128x128xf32>
    %11 = math.exp %10 : vector<128x128xf32>
    %cst_9 = arith.constant dense<0.000000e+00> : vector<4x128xf32>
    %12 = tpu.matmul %5, %11, %cst_9 {dimension_numbers = #tpu.dot_dimension_numbers<[1], [0], [0], [1], [0, 0, 1, 1], [], []>} : vector<4x128xf32>, vector<128x128xf32>, vector<4x128xf32> -> vector<4x128xf32>
    %13 = vector.extract_strided_slice %12 {offsets = [0, 0], sizes = [3, 128], strides = [1, 1]} : vector<4x128xf32> to vector<3x128xf32>
    %14 = vector.extract_strided_slice %12 {offsets = [3, 0], sizes = [1, 128], strides = [1, 1]} : vector<4x128xf32> to vector<1x128xf32>
    %15 = vector.extract_strided_slice %1 {offsets = [0, 0], sizes = [3, 128], strides = [1, 1]} : vector<5x128xf32> to vector<3x128xf32>
    %16 = tpu.reciprocal %14 : vector<1x128xf32> -> vector<1x128xf32>
    %17 = vector.broadcast %16 : vector<1x128xf32> to vector<3x128xf32>
    %18 = arith.mulf %13, %17 : vector<3x128xf32>
    %19 = arith.addf %15, %18 : vector<3x128xf32>
    %c0_10 = arith.constant 0 : index
    %c0_11 = arith.constant 0 : index
    %c0_12 = arith.constant 0 : index
    %20 = vector.load %arg6[%c0_10, %c0_11, %c0_12] : memref<1x3x128xf32, #tpu.memory_space<vmem>>, vector<1x3x128xf32>
    %21 = vector.shape_cast %20 : vector<1x3x128xf32> to vector<3x128xf32>
    %22 = vector.shape_cast %19 : vector<3x128xf32> to vector<1x3x128xf32>
    tpu.vector_store %arg6[%c0_10, %c0_11, %c0_12], %22 {strides = array<i32>} : memref<1x3x128xf32, #tpu.memory_space<vmem>>, vector<1x3x128xf32>,
    return
  }
  func.func @transform_0(%arg0: i32, %arg1: i32, %arg2: i32) -> (i32, i32, i32) {
    %c0_i32 = arith.constant 0 : i32
    %c0_i32_0 = arith.constant 0 : i32
    return %arg0, %c0_i32, %arg1 : i32, i32, i32
  }
  func.func @transform_1(%arg0: i32, %arg1: i32, %arg2: i32) -> (i32, i32, i32) {
    %c0_i32 = arith.constant 0 : i32
    %c0_i32_0 = arith.constant 0 : i32
    return %arg0, %arg2, %c0_i32 : i32, i32, i32
  }
  func.func @transform_2(%arg0: i32, %arg1: i32, %arg2: i32) -> (i32, i32, i32) {
    %c0_i32 = arith.constant 0 : i32
    %c0_i32_0 = arith.constant 0 : i32
    return %arg0, %c0_i32, %arg2 : i32, i32, i32
  }
  func.func @transform_3(%arg0: i32, %arg1: i32, %arg2: i32) -> (i32, i32, i32) {
    %c0_i32 = arith.constant 0 : i32
    %c0_i32_0 = arith.constant 0 : i32
    return %arg0, %c0_i32, %arg1 : i32, i32, i32
  }
}

</mosaic_0001>

<bundles_post_ra>
// kernel: tpu_custom_call.1
= control target key start
LH: loop header
LB: loop body
LE: loop exit
PB: predicated region body
PF: predicated region fallthrough
CT: control target
= control target key end

     0   :  { %s972_s12 = smov 0   ;;  %s974_s13 = smov 0   ;;  %s1114_s0 = inlined_call_operand.vmem [shape: f32[2,5,128], index: 0, kind: input, shape index: {}]   ;;  %s1115_s1 = inlined_call_operand.vmem [shape: f32[2,128,5], index: 1, kind: input, shape index: {}]   ;;  %s1116_s2 = inlined_call_operand.vmem [shape: f32[2,4,128], index: 2, kind: input, shape index: {}]   ;;  %s1117_s3 = inlined_call_operand.vmem [shape: f32[2,3,128], index: 3, kind: output, shape index: {}]  }
   0x1   :  { %s976_s14 = smov 0  }
   0x2 LB: > { %s32_s15 = sadd.s32 1, %s944_s13  ;;  %p745_p0 = scmp.ge.s32.totalorder %s948_s14, 1  ;;  %s948_s14 = sphi %s976_s14, %s13_s14   ;;  %s944_s13 = sphi %s974_s13, %s1119_s13   ;;  %s940_s12 = sphi %s972_s12, %s1118_s12  }
   0x3   : > { %p34_p1 = scmp.ge.s32.totalorder %s32_s15, 2  ;;  %p193_p2 = scmp.lt.s32.totalorder %s948_s14, 3 }
   0x5   : > { %s1121_s15 = smov (%p34_p1, %s32_s15), 0  ;;  %p194_p3 = pnand %p745_p0, %p193_p2 }
   0x6   : > { %p237_p4 = scmp.lt.s32.totalorder (!%p194_p3), %s940_s12, 1 }
   0x7   : > { %197 = sbr.rel (%p194_p3) target bundleno = 522 (0x20a), region = 32 }
   0xc   : > { %s1123_s12 = smov (!%p237_p4, %s940_s12), 1  ;;  %vm335_vm0 = vcmask 1044480   ;;  %vm286_vm1 = vcmask 39936   ;;  %v950_v17 = vmov 0.0   ;;  %vm951_vm2 = vmmov 0  }
   0xd   : > { %s746_s16 = sshll.u32 %s1123_s12, 3  ;;  %s770_s17 = sshll.u32 %s1123_s12, 7  ;;  %831 = vmatprep.subr.mxu1 %v950_v17  ;;  %863 = vmatprep.mubr.msk.f32.mxu1 %vm951_vm2, %v950_v17 }
   0xe   : > { %s243_s20 = scalar_lea.vmem %s1114_s0, %s746_s16  ;;  %s1000_s23 = scalar_lea.vmem %s1115_s1, %s770_s17 }
   0xf   : > { %v1002_v0 = vld [vmem:[%s243_s20] sm:$0x1f]  ;;  %v270_v2 = vld [vmem:[%s1000_s23 + $0x8] sm:$0xff]  ;;  %v271_v3 = vld [vmem:[%s1000_s23 + $0x10] sm:$0xff]  ;;  %s749_s24 = sshll.u32 %s1123_s12, 2 }
  0x10   : > { %v269_v1 = vld [vmem:[%s1000_s23] sm:$0xff]  ;;  %805 = vmatprep.subr.msk.mxu0 %vm335_vm0, %v1002_v0  ;;  %v272_v4 = vld [vmem:[%s1000_s23 + $0x18] sm:$0xff]  ;;  %v274_v6 = vld [vmem:[%s1000_s23 + $0x28] sm:$0xff]  ;;  %s260_s27 = scalar_lea.vmem %s1116_s2, %s749_s24  ;;  %s267_s30 = scalar_lea.vmem %s1117_s3, %s749_s24 }
  0x11   : > { %807 = vmatprep.mubr.msk.f32.mxu0 %vm286_vm1, %v269_v1  ;;  %806 = vmatpush3.msk.msra.mxu0 %vm335_vm0, %v1002_v0  ;;  %v273_v5 = vld [vmem:[%s1000_s23 + $0x20] sm:$0xff]  ;;  %v275_v7 = vld [vmem:[%s1000_s23 + $0x30] sm:$0xff]  ;;  %v276_v8 = vld [vmem:[%s1000_s23 + $0x38] sm:$0xff] }
  0x12   : > { %808 = vmatmul.mubr.msk.f32.vlgmr.msra.gmra.mxu0 %vm286_vm1, %v270_v2  ;;  %v277_v9 = vld [vmem:[%s1000_s23 + $0x40] sm:$0xff]  ;;  %v278_v10 = vld [vmem:[%s1000_s23 + $0x48] sm:$0xff]  ;;  %v279_v11 = vld [vmem:[%s1000_s23 + $0x50] sm:$0xff] }
  0x13   : > { %810 = vmatprep.mubr.msk.f32.mxu0 %vm286_vm1, %v271_v3  ;;  %v280_v12 = vld [vmem:[%s1000_s23 + $0x58] sm:$0xff]  ;;  %v281_v13 = vld [vmem:[%s1000_s23 + $0x60] sm:$0xff]  ;;  %v282_v14 = vld [vmem:[%s1000_s23 + $0x68] sm:$0xff] }
  0x14   : > { %v283_v15 = vld [vmem:[%s1000_s23 + $0x70] sm:$0xff]  ;;  %v284_v16 = vld [vmem:[%s1000_s23 + $0x78] sm:$0xff] }
  0x16   : > { %811 = vmatmul.mubr.msk.f32.gmra.mxu0 %vm286_vm1, %v272_v4 }
  0x17   : > { %813 = vmatprep.mubr.msk.f32.mxu0 %vm286_vm1, %v273_v5 }
  0x1a   : > { %814 = vmatmul.mubr.msk.f32.gmra.mxu0 %vm286_vm1, %v274_v6 }
  0x1b   : > { %816 = vmatprep.mubr.msk.f32.mxu0 %vm286_vm1, %v275_v7 }
  0x1e   : > { %817 = vmatmul.mubr.msk.f32.gmra.mxu0 %vm286_vm1, %v276_v8 }
  0x1f   : > { %819 = vmatprep.mubr.msk.f32.mxu0 %vm286_vm1, %v277_v9 }
  0x22   : > { %820 = vmatmul.mubr.msk.f32.gmra.mxu0 %vm286_vm1, %v278_v10 }
  0x23   : > { %822 = vmatprep.mubr.msk.f32.mxu0 %vm286_vm1, %v279_v11 }
  0x26   : > { %823 = vmatmul.mubr.msk.f32.gmra.mxu0 %vm286_vm1, %v280_v12 }
  0x27   : > { %825 = vmatprep.mubr.msk.f32.mxu0 %vm286_vm1, %v281_v13 }
  0x2a   : > { %826 = vmatmul.mubr.msk.f32.gmra.mxu0 %vm286_vm1, %v282_v14 }
  0x2b   : > { %828 = vmatprep.mubr.msk.f32.mxu0 %vm286_vm1, %v283_v15 }
  0x2e   : > { %829 = vmatmul.mubr.msk.f32.gmra.mxu0 %vm286_vm1, %v284_v16 }
  0xd2   : > { %v1040_v18 = vpop.f32.mrf.mxu0 }
  0xd4   : > { %v1042_v19 = vpop.f32.mrf.mxu0 }
  0xd6   : > { %v1044_v20 = vpop.f32.mrf.mxu0 }
  0xd8   : > { %v1046_v21 = vpop.f32.mrf.mxu0 }
  0xda   : > { %v1048_v22 = vpop.f32.mrf.mxu0 }
  0xdb   : > { %v485_v33 = vmax.f32 %v1040_v18, %v1048_v22 }
  0xdc   : > { %v1050_v23 = vpop.f32.mrf.mxu0 }
  0xdd   : > { %v484_v31 = vmax.f32 %v1042_v19, %v1050_v23 }
  0xde   : > { %v818_v24 = vpop.f32.mrf.mxu0 }
  0xdf   : > { %v487_v34 = vmax.f32 %v1044_v20, %v818_v24 }
  0xe0   : > { %v435_v25 = vpop.f32.mrf.mxu0 }
  0xe1   : > { %v486_v35 = vmax.f32 %v1046_v21, %v435_v25 }
  0xe2   : > { %v821_v26 = vpop.f32.mrf.mxu0 }
  0xe3   : > { %v489_v38 = vmax.f32 %v485_v33, %v821_v26 }
  0xe4   : > { %v445_v27 = vpop.f32.mrf.mxu0 }
  0xe5   : > { %v488_v36 = vmax.f32 %v484_v31, %v445_v27 }
  0xe6   : > { %v824_v28 = vpop.f32.mrf.mxu0 }
  0xe7   : > { %v491_v39 = vmax.f32 %v487_v34, %v824_v28 }
  0xe8   : > { %v455_v29 = vpop.f32.mrf.mxu0 }
  0xe9   : > { %v490_v40 = vmax.f32 %v486_v35, %v455_v29 }
  0xea   : > { %v827_v30 = vpop.f32.mrf.mxu0 }
  0xeb   : > { %v493_v43 = vmax.f32 %v489_v38, %v827_v30 }
  0xec   : > { %v465_v32 = vpop.f32.mrf.mxu0 }
  0xed   : > { %v492_v41 = vmax.f32 %v488_v36, %v465_v32 }
  0xee   : > { %v830_v37 = vpop.f32.mrf.mxu0 }
  0xef   : > { %v495_v44 = vmax.f32 %v491_v39, %v830_v37  ;;  %v496_v46 = vmax.f32 %v492_v41, %v493_v43 }
  0xf0   : > { %v475_v42 = vpop.f32.mrf.mxu0 }
  0xf1   : > { %v494_v45 = vmax.f32 %v490_v40, %v475_v42  ;;  %v285_v40 = vld [vmem:[%s260_s27] sm:$0xf] }
  0xf3   : > { %v497_v47 = vmax.f32 %v494_v45, %v495_v44  ;;  %v624_v44 = vlaneseq }
  0xf5   : > { %v498_v48 = vmax.f32 %v496_v46, %v497_v47  ;;  %v625_v45 = vshrl.u32 %v624_v44, 7 }
  0xf7   : > { %v499_v49 = vrot.slane %v498_v48, 4  ;;  %v626_v46 = vsub.s32 3, %v625_v45 }
  0xf9   : > { %v500_v50 = vmax.f32 %v498_v48, %v499_v49 }
  0xfb   : > { %v501_v51 = vrot.slane %v500_v50, 2 }
  0xfd   : > { %v502_v52 = vmax.f32 %v500_v50, %v501_v51 }
  0xff   : > { %v503_v53 = vrot.slane %v502_v52, 1 }
 0x101   : > { %v1058_v54 = vmax.f32 %v502_v52, %v503_v53 }
 0x103   : > { %v519_v55 = vsub.f32 %v475_v42, %v1058_v54  ;;  %v520_v56 = vsub.f32 %v830_v37, %v1058_v54  ;;  %v518_v57 = vsub.f32 %v827_v30, %v1058_v54  ;;  %v517_v60 = vsub.f32 %v465_v32, %v1058_v54 }
 0x104   : > { %v516_v62 = vsub.f32 %v824_v28, %v1058_v54  ;;  %v515_v1 = vsub.f32 %v455_v29, %v1058_v54  ;;  %v514_v3 = vsub.f32 %v821_v26, %v1058_v54  ;;  %v513_v5 = vsub.f32 %v445_v27, %v1058_v54 }
 0x105   : > { %v551_v58 = vmul.f32 1.442695, %v520_v56  ;;  %v549_v59 = vmul.f32 1.442695, %v519_v55  ;;  %v547_v61 = vmul.f32 1.442695, %v518_v57  ;;  %v512_v7 = vsub.f32 %v818_v24, %v1058_v54 }
 0x106   : > { %v545_v63 = vmul.f32 1.442695, %v517_v60  ;;  %v543_v2 = vmul.f32 1.442695, %v516_v62  ;;  %v541_v4 = vmul.f32 1.442695, %v515_v1  ;;  %v511_v9 = vsub.f32 %v435_v25, %v1058_v54 }
 0x107   : > { %892 = vpow2.f32 %v551_v58  ;;  %v539_v6 = vmul.f32 1.442695, %v514_v3  ;;  %v537_v8 = vmul.f32 1.442695, %v513_v5  ;;  %v535_v10 = vmul.f32 1.442695, %v512_v7 }
 0x108   : > { %894 = vpow2.f32 %v549_v59  ;;  %v510_v11 = vsub.f32 %v1048_v22, %v1058_v54  ;;  %v533_v13 = vmul.f32 1.442695, %v511_v9  ;;  %v509_v14 = vsub.f32 %v1050_v23, %v1058_v54 }
 0x109   : > { %896 = vpow2.f32 %v547_v61  ;;  %v508_v24 = vsub.f32 %v1044_v20, %v1058_v54  ;;  %v507_v26 = vsub.f32 %v1046_v21, %v1058_v54  ;;  %v506_v28 = vsub.f32 %v1040_v18, %v1058_v54 }
 0x10a   : > { %898 = vpow2.f32 %v545_v63  ;;  %v531_v16 = vmul.f32 1.442695, %v510_v11  ;;  %v529_v22 = vmul.f32 1.442695, %v509_v14  ;;  %v505_v30 = vsub.f32 %v1042_v19, %v1058_v54 }
 0x10b   : > { %900 = vpow2.f32 %v543_v2  ;;  %v527_v23 = vmul.f32 1.442695, %v508_v24  ;;  %v525_v20 = vmul.f32 1.442695, %v507_v26  ;;  %v523_v21 = vmul.f32 1.442695, %v506_v28 }
 0x10c   : > { %902 = vpow2.f32 %v541_v4  ;;  %v521_v18 = vmul.f32 1.442695, %v505_v30 }
 0x10d   : > { %904 = vpow2.f32 %v539_v6 }
 0x10e   : > { %906 = vpow2.f32 %v537_v8 }
 0x10f   : > { %908 = vpow2.f32 %v535_v10 }
 0x110   : > { %910 = vpow2.f32 %v533_v13 }
 0x111   : > { %912 = vpow2.f32 %v531_v16 }
 0x112   : > { %914 = vpow2.f32 %v529_v22 }
 0x113   : > { %916 = vpow2.f32 %v527_v23 }
 0x114   : > { %v893_v12 = vpop.eup %892  ;;  %918 = vpow2.f32 %v525_v20 }
 0x115   : > { %832 = vmatpush3.msra.mxu1 %v893_v12  ;;  %v895_v15 = vpop.eup %894  ;;  %920 = vpow2.f32 %v523_v21 }
 0x116   : > { %833 = vmatprep.subr.mxu1 %v950_v17  ;;  %v897_v25 = vpop.eup %896  ;;  %922 = vpow2.f32 %v521_v18 }
 0x117   : > { %834 = vmatpush3.msra.mxu1 %v895_v15  ;;  %v899_v27 = vpop.eup %898 }
 0x118   : > { %835 = vmatprep.subr.mxu1 %v950_v17  ;;  %v901_v29 = vpop.eup %900 }
 0x119   : > { %836 = vmatpush3.msra.mxu1 %v897_v25  ;;  %v903_v31 = vpop.eup %902 }
 0x11a   : > { %837 = vmatprep.subr.mxu1 %v950_v17  ;;  %v905_v32 = vpop.eup %904 }
 0x11b   : > { %838 = vmatpush3.msra.mxu1 %v899_v27  ;;  %v907_v33 = vpop.eup %906 }
 0x11c   : > { %839 = vmatprep.subr.mxu1 %v950_v17  ;;  %v909_v34 = vpop.eup %908 }
 0x11d   : > { %840 = vmatpush3.msra.mxu1 %v901_v29  ;;  %v911_v19 = vpop.eup %910 }
 0x11e   : > { %841 = vmatprep.subr.mxu1 %v950_v17  ;;  %v913_v35 = vpop.eup %912 }
 0x11f   : > { %842 = vmatpush3.msra.mxu1 %v903_v31  ;;  %v915_v36 = vpop.eup %914 }
 0x120   : > { %843 = vmatprep.subr.mxu1 %v950_v17  ;;  %v917_v37 = vpop.eup %916 }
 0x121   : > { %844 = vmatpush3.msra.mxu1 %v905_v32  ;;  %v919_v38 = vpop.eup %918 }
 0x122   : > { %845 = vmatprep.subr.mxu1 %v950_v17  ;;  %v921_v39 = vpop.eup %920 }
 0x123   : > { %846 = vmatpush3.msra.mxu1 %v907_v33  ;;  %v923_v41 = vpop.eup %922 }
 0x124   : > { %847 = vmatprep.subr.mxu1 %v950_v17 }
 0x125   : > { %848 = vmatpush3.msra.mxu1 %v909_v34 }
 0x126   : > { %849 = vmatprep.subr.mxu1 %v950_v17 }
 0x127   : > { %850 = vmatpush3.msra.mxu1 %v911_v19 }
 0x128   : > { %851 = vmatprep.subr.mxu1 %v950_v17 }
 0x129   : > { %852 = vmatpush3.msra.mxu1 %v913_v35 }
 0x12a   : > { %853 = vmatprep.subr.mxu1 %v950_v17 }
 0x12b   : > { %854 = vmatpush3.msra.mxu1 %v915_v36 }
 0x12c   : > { %855 = vmatprep.subr.mxu1 %v950_v17 }
 0x12d   : > { %856 = vmatpush3.msra.mxu1 %v917_v37 }
 0x12e   : > { %857 = vmatprep.subr.mxu1 %v950_v17 }
 0x12f   : > { %858 = vmatpush3.msra.mxu1 %v919_v38 }
 0x130   : > { %859 = vmatprep.subr.mxu1 %v950_v17 }
 0x131   : > { %860 = vmatpush3.msra.mxu1 %v921_v39 }
 0x132   : > { %861 = vmatprep.subr.mxu1 %v950_v17 }
 0x133   : > { %862 = vmatpush3.msra.mxu1 %v923_v41 }
 0x134   : > { %864 = vmatmul.mubr.f32.vlgmr.msra.gmra.mxu1 %v285_v40 }
 0x1f4   : > { %v619_v42 = vpop.f32.mrf.mxu1 }
 0x1f5   : > { %924 = vrcp.f32 %v619_v42 }
 0x1f6   : > { %v865_v43 = vpop.f32.mrf.mxu1 }
 0x202   : > { %v925_v47 = vpop.eup %924 }
 0x203   : > { %v627_v48 = vrot.slane %v925_v47, %v626_v46 }
 0x205   : > { %v628_v49 = vmul.f32 %v627_v48, %v619_v42 }
 0x207   : > { %v629_v50 = vadd.f32 %v628_v49, %v1002_v0 }
 0x209   : > { %630 = vst [vmem:[%s267_s30] sm:$0x7] %v629_v50 }
 0x20a PF: > { %s13_s14 = sadd.s32 1, %s948_s14   ;;  %s1118_s12 = smov %s944_s13 }
 0x20b   : > { %p10_p5 = scmp.ge.s32.totalorder %s13_s14, 4   ;;  %s1119_s13 = smov %s1121_s15 }
 0x20d   :  { %12 = sbr.rel (!%p10_p5) target bundleno = 2 (0x2), region = 68 }

</bundles_post_ra>
